<compile_context>
chip_gen: v7x
topology: tpu7x:2x2x1
jax: 0.10.0
libtpu: 0.0.40
codegen_flags: <defaults>
</compile_context>

<pallas_src>
import jax
import jax.numpy as jnp
from jax import lax
from jax.experimental import pallas as pl
from jax.experimental.pallas import tpu as pltpu


# --------------------------- fused forward kernel ---------------------------

def _make_attention_kernel(*, num_heads, scale, block_b, seq_len, has_qkv_bias):
    """Builds the fused kernel.  Two variants: with / without a qkv bias ref."""

    def kernel(*refs):
        if has_qkv_bias:
            x_ref, wqkv_ref, bqkv_ref, wproj_ref, bproj_ref, o_ref, qkv_scr = refs
        else:
            x_ref, wqkv_ref, wproj_ref, bproj_ref, o_ref, qkv_scr = refs
            bqkv_ref = None

        M, C = x_ref.shape            # M = block_b * seq_len
        hd = C // num_heads
        N = seq_len

        # ---- QKV projection over the full (Bt*N, C) row block: bf16 operands
        #      on the MXU, f32 accumulation. ----
        x = x_ref[...].astype(jnp.bfloat16)                      # (M, C)
        qkv = jnp.dot(x, wqkv_ref[...],
                      preferred_element_type=jnp.float32)        # (M, 3C) f32
        if bqkv_ref is not None:
            qkv = qkv + bqkv_ref[...]

        # ---- Single full-width bf16 cast, parked in VMEM.  The softmax scale
        #      is folded into the q columns (f32 multiply, pre-cast). ----
        qkv_scr[:, :C] = (qkv[:, :C] * scale).astype(jnp.bfloat16)
        qkv_scr[:, C:] = qkv[:, C:].astype(jnp.bfloat16)

        bias = bproj_ref[...]                                    # (1, C) f32

        # ---- Per-(batch, head) attention.  The output projection is
        #      accumulated per head (projection K-dim split across heads), so
        #      the merged heads tensor is never materialized.  All slices are
        #      128-aligned columns / 8-aligned rows -> lane-dense accesses.
        #      (At real ViT sizes N >= 196 each per-batch matmul already fills
        #      the MXU M-dim; the QKV matmul above uses the full Bt*N rows.)
        for b in range(block_b):
            r0 = b * N
            acc = jnp.zeros((N, C), jnp.float32)
            for h in range(num_heads):
                c0 = h * hd
                q = qkv_scr[r0:r0 + N, c0:c0 + hd]               # bf16, pre-scaled
                k = qkv_scr[r0:r0 + N, C + c0:C + c0 + hd]       # bf16
                v = qkv_scr[r0:r0 + N, 2 * C + c0:2 * C + c0 + hd]

                # q @ k^T without materializing a transpose: contract last dims.
                s = lax.dot_general(
                    q, k, dimension_numbers=(((1,), (1,)), ((), ())),
                    preferred_element_type=jnp.float32)          # (N, N) f32

                m = jnp.max(s, axis=-1, keepdims=True)
                p = jnp.exp(s - m)
                attn = p * pl.reciprocal(jnp.sum(p, axis=-1, keepdims=True),
                                         approx=True)            # softmax rows

                o_h = jnp.dot(attn.astype(jnp.bfloat16), v,
                              preferred_element_type=jnp.float32)  # (N, hd)

                # Per-head output-projection accumulation.
                acc = acc + jnp.dot(o_h.astype(jnp.bfloat16),
                                    wproj_ref[c0:c0 + hd, :],
                                    preferred_element_type=jnp.float32)

            o_ref[r0:r0 + N, :] = (acc + bias).astype(o_ref.dtype)

    return kernel


def _choose_block_b(B, N, target_rows=256, max_rows=2048):
    """Smallest divisor of B whose row count reaches the MXU-fill target."""
    best = 1
    for d in range(1, B + 1):
        if B % d:
            continue
        if d * N <= max_rows:
            best = d
        if d * N >= target_rows:
            break
    return best


def attention_forward(x, params, num_heads, block_b=None):
    """x: (B, N, C) -> (B, N, C).  Fully fused, Bt batch elements per step."""
    B, N, C = x.shape
    assert C % num_heads == 0
    hd = C // num_heads
    scale = hd ** (-0.5)

    has_bias = "b_qkv" in params and params["b_qkv"] is not None

    if block_b is None:
        block_b = _choose_block_b(B, N)
    assert B % block_b == 0
    M = block_b * N

    kernel = _make_attention_kernel(num_heads=num_heads, scale=scale,
                                    block_b=block_b, seq_len=N,
                                    has_qkv_bias=has_bias)

    # Flatten (B, N, C) -> (B*N, C) outside the kernel (free XLA reshape) so
    # every in-kernel matmul and the output store are plain lane-dense 2D ops.
    x2d = x.reshape(B * N, C)

    in_specs = [
        pl.BlockSpec((M, C), lambda i: (i, 0)),          # activations row block
        pl.BlockSpec((C, 3 * C), lambda i: (0, 0)),      # resident qkv weight
    ]
    inputs = [x2d, params["w_qkv"]]
    if has_bias:
        in_specs.append(pl.BlockSpec((1, 3 * C), lambda i: (0, 0)))
        inputs.append(params["b_qkv"].reshape(1, 3 * C).astype(jnp.float32))
    in_specs += [
        pl.BlockSpec((C, C), lambda i: (0, 0)),          # resident proj weight
        pl.BlockSpec((1, C), lambda i: (0, 0)),          # resident proj bias
    ]
    inputs += [params["w_proj"], params["b_proj"].reshape(1, C)]

    out2d = pl.pallas_call(
        kernel,
        out_shape=jax.ShapeDtypeStruct((B * N, C), x.dtype),
        grid=(B // block_b,),
        in_specs=in_specs,
        out_specs=pl.BlockSpec((M, C), lambda i: (i, 0)),
        scratch_shapes=[pltpu.VMEM((M, 3 * C), jnp.bfloat16)],   # bf16 qkv park
        compiler_params=pltpu.CompilerParams(
            dimension_semantics=("parallel",),           # megacore over blocks
            vmem_limit_bytes=48 * 1024 * 1024,           # < v7x 64 MiB physical
        ),
    )(*inputs)
    return out2d.reshape(B, N, C)


# ------------------------------- parameters ---------------------------------

def init_attention_params(key, dim, qkv_bias=False):
    """Deterministic synthetic parameters.

    Weights are stored (in_features, out_features) so the kernel does x @ W,
    and kept in bf16 (MXU-native operands); biases stay f32 and are added
    after the f32 accumulation.
    """
    k1, k2, k3, k4 = jax.random.split(key, 4)
    w_qkv = (jax.random.normal(k1, (dim, 3 * dim), jnp.float32) * 0.02
             ).astype(jnp.bfloat16)
    w_proj = (jax.random.normal(k2, (dim, dim), jnp.float32) * 0.02
              ).astype(jnp.bfloat16)
    b_proj = jax.random.normal(k3, (1, dim), jnp.float32) * 0.02
    params = {"w_qkv": w_qkv, "w_proj": w_proj, "b_proj": b_proj}
    if qkv_bias:
        params["b_qkv"] = jax.random.normal(k4, (1, 3 * dim), jnp.float32) * 0.02
    return params


# -------------------------------- reference ---------------------------------

def attention_reference(x, params, num_heads):
    B, N, C = x.shape
    hd = C // num_heads
    w_qkv = params["w_qkv"].astype(jnp.float32)
    w_proj = params["w_proj"].astype(jnp.float32)
    qkv = x.reshape(B * N, C) @ w_qkv
    if "b_qkv" in params:
        qkv = qkv + params["b_qkv"]
    qkv = qkv.reshape(B, N, 3, num_heads, hd).transpose(2, 0, 3, 1, 4)
    q, k, v = qkv[0], qkv[1], qkv[2]
    attn = jnp.einsum("bhnd,bhmd->bhnm", q, k) * (hd ** -0.5)
    attn = jax.nn.softmax(attn, axis=-1)
    o = jnp.einsum("bhnm,bhmd->bhnd", attn, v)
    o = o.transpose(0, 2, 1, 3).reshape(B * N, C)
    o = o @ w_proj + params["b_proj"]
    return o.reshape(B, N, C)


# ----------------------------------- main ------------------------------------

if __name__ == "__main__":
    B, N, C = 2, 16, 256
    num_heads = 2  # head_dim = 128 -> lane-aligned per-head column slices

    key = jax.random.PRNGKey(0)
    kx, kp1, kp2 = jax.random.split(key, 3)
    x = jax.random.normal(kx, (B, N, C), jnp.float32)

    # ---- qkv_bias=False (module default): bias-free kernel variant. ----
    params = init_attention_params(kp1, C, qkv_bias=False)
    out = jax.block_until_ready(attention_forward(x, params, num_heads))
    ref = attention_reference(x, params, num_heads)
    assert out.shape == (B, N, C)
    # bf16 MXU operands with f32 accumulation + approx-reciprocal softmax ->
    # compare against the f32 reference at bf16-appropriate tolerance.
    assert jnp.allclose(out, ref, atol=1e-2, rtol=1e-2), "mismatch (no bias)"

    # ---- qkv_bias=True: nonzero bias, validates the bias-add codepath. ----
    params_b = init_attention_params(kp2, C, qkv_bias=True)
    out_b = jax.block_until_ready(attention_forward(x, params_b, num_heads))
    ref_b = attention_reference(x, params_b, num_heads)
    assert jnp.allclose(out_b, ref_b, atol=1e-2, rtol=1e-2), "mismatch (bias)"

    print("KERNEL_OK")
</pallas_src>

<mosaic_0001>
module attributes {stable_mosaic.version = 11 : i64} {
  func.func @kernel(%arg0: i32, %arg1: memref<32x256xf32, #tpu.memory_space<vmem>>, %arg2: memref<256x768xbf16, #tpu.memory_space<vmem>>, %arg3: memref<256x256xbf16, #tpu.memory_space<vmem>>, %arg4: memref<1x256xf32, #tpu.memory_space<vmem>>, %arg5: memref<32x256xf32, #tpu.memory_space<vmem>>, %arg6: memref<32x768xbf16, #tpu.memory_space<vmem>>) attributes {dimension_semantics = [#tpu.dimension_semantics<parallel>], iteration_bounds = array<i64: 1>, scalar_prefetch = 0 : i64, scratch_operands = 1 : i64, tpu.core_type = #tpu.core_type<tc>, window_params = [{transform_indices = @transform_0, window_bounds = array<i64: 32, 256>}, {pipeline_mode = #tpu.pipeline_mode<synchronous>, transform_indices = @transform_1, window_bounds = array<i64: 256, 768>}, {pipeline_mode = #tpu.pipeline_mode<synchronous>, transform_indices = @transform_2, window_bounds = array<i64: 256, 256>}, {pipeline_mode = #tpu.pipeline_mode<synchronous>, transform_indices = @transform_3, window_bounds = array<i64: 1, 256>}, {transform_indices = @transform_4, window_bounds = array<i64: 32, 256>}]} {
    %c0 = arith.constant 0 : index
    %c0_0 = arith.constant 0 : index
    %0 = vector.load %arg1[%c0, %c0_0] : memref<32x256xf32, #tpu.memory_space<vmem>>, vector<32x256xf32>
    %1 = arith.truncf %0 : vector<32x256xf32> to vector<32x256xbf16>
    %c0_1 = arith.constant 0 : index
    %c0_2 = arith.constant 0 : index
    %2 = vector.load %arg2[%c0_1, %c0_2] : memref<256x768xbf16, #tpu.memory_space<vmem>>, vector<256x768xbf16>
    %cst = arith.constant dense<0.000000e+00> : vector<32x768xf32>
    %3 = tpu.matmul %1, %2, %cst {dimension_numbers = #tpu.dot_dimension_numbers<[1], [0], [0], [1], [0, 0, 1, 1], [], []>} : vector<32x256xbf16>, vector<256x768xbf16>, vector<32x768xf32> -> vector<32x768xf32>
    %4 = vector.extract_strided_slice %3 {offsets = [0, 0], sizes = [32, 256], strides = [1, 1]} : vector<32x768xf32> to vector<32x256xf32>
    %cst_3 = arith.constant 0.0883883461 : f32
    %5 = vector.broadcast %cst_3 : f32 to vector<32x256xf32>
    %6 = arith.mulf %4, %5 : vector<32x256xf32>
    %7 = arith.truncf %6 : vector<32x256xf32> to vector<32x256xbf16>
    %c0_4 = arith.constant 0 : index
    %c0_5 = arith.constant 0 : index
    %8 = vector.load %arg6[%c0_4, %c0_5] : memref<32x768xbf16, #tpu.memory_space<vmem>>, vector<32x256xbf16>
    tpu.vector_store %arg6[%c0_4, %c0_5], %7 {strides = array<i32>} : memref<32x768xbf16, #tpu.memory_space<vmem>>, vector<32x256xbf16>,
    %9 = vector.extract_strided_slice %3 {offsets = [0, 256], sizes = [32, 512], strides = [1, 1]} : vector<32x768xf32> to vector<32x512xf32>
    %10 = arith.truncf %9 : vector<32x512xf32> to vector<32x512xbf16>
    %c0_6 = arith.constant 0 : index
    %c256 = arith.constant 256 : index
    %11 = vector.load %arg6[%c0_6, %c256] : memref<32x768xbf16, #tpu.memory_space<vmem>>, vector<32x512xbf16>
    tpu.vector_store %arg6[%c0_6, %c256], %10 {strides = array<i32>} : memref<32x768xbf16, #tpu.memory_space<vmem>>, vector<32x512xbf16>,
    %c0_7 = arith.constant 0 : index
    %c0_8 = arith.constant 0 : index
    %12 = vector.load %arg4[%c0_7, %c0_8] : memref<1x256xf32, #tpu.memory_space<vmem>>, vector<1x256xf32>
    %cst_9 = arith.constant 0.000000e+00 : f32
    %13 = vector.broadcast %cst_9 : f32 to vector<16x256xf32>
    %c0_10 = arith.constant 0 : index
    %c0_11 = arith.constant 0 : index
    %14 = vector.load %arg6[%c0_10, %c0_11] : memref<32x768xbf16, #tpu.memory_space<vmem>>, vector<16x128xbf16>
    %c0_12 = arith.constant 0 : index
    %c256_13 = arith.constant 256 : index
    %15 = vector.load %arg6[%c0_12, %c256_13] : memref<32x768xbf16, #tpu.memory_space<vmem>>, vector<16x128xbf16>
    %c0_14 = arith.constant 0 : index
    %c512 = arith.constant 512 : index
    %16 = vector.load %arg6[%c0_14, %c512] : memref<32x768xbf16, #tpu.memory_space<vmem>>, vector<16x128xbf16>
    %cst_15 = arith.constant dense<0.000000e+00> : vector<16x16xf32>
    %17 = tpu.matmul %14, %15, %cst_15 {dimension_numbers = #tpu.dot_dimension_numbers<[1], [1], [0], [0], [0, 0, 1, 0], [], []>} : vector<16x128xbf16>, vector<16x128xbf16>, vector<16x16xf32> -> vector<16x16xf32>
    %cst_16 = arith.constant dense<0xFF800000> : vector<16xf32>
    %18 = vector.multi_reduction <maximumf>, %17, %cst_16 [1] : vector<16x16xf32> to vector<16xf32>
    %19 = vector.shape_cast %18 : vector<16xf32> to vector<16x1xf32>
    %20 = vector.broadcast %19 : vector<16x1xf32> to vector<16x16xf32>
    %21 = arith.subf %17, %20 : vector<16x16xf32>
    %22 = math.exp %21 : vector<16x16xf32>
    %cst_17 = arith.constant dense<0.000000e+00> : vector<16xf32>
    %23 = vector.multi_reduction <add>, %22, %cst_17 [1] : vector<16x16xf32> to vector<16xf32>
    %24 = vector.shape_cast %23 : vector<16xf32> to vector<16x1xf32>
    %25 = tpu.reciprocal %24 {approx = true} : vector<16x1xf32> -> vector<16x1xf32>
    %26 = vector.broadcast %25 : vector<16x1xf32> to vector<16x16xf32>
    %27 = arith.mulf %22, %26 : vector<16x16xf32>
    %28 = arith.truncf %27 : vector<16x16xf32> to vector<16x16xbf16>
    %cst_18 = arith.constant dense<0.000000e+00> : vector<16x128xf32>
    %29 = tpu.matmul %28, %16, %cst_18 {dimension_numbers = #tpu.dot_dimension_numbers<[1], [0], [0], [1], [0, 0, 1, 1], [], []>} : vector<16x16xbf16>, vector<16x128xbf16>, vector<16x128xf32> -> vector<16x128xf32>
    %30 = arith.truncf %29 : vector<16x128xf32> to vector<16x128xbf16>
    %c0_19 = arith.constant 0 : index
    %c0_20 = arith.constant 0 : index
    %31 = vector.load %arg3[%c0_19, %c0_20] : memref<256x256xbf16, #tpu.memory_space<vmem>>, vector<128x256xbf16>
    %cst_21 = arith.constant dense<0.000000e+00> : vector<16x256xf32>
    %32 = tpu.matmul %30, %31, %cst_21 {dimension_numbers = #tpu.dot_dimension_numbers<[1], [0], [0], [1], [0, 0, 1, 1], [], []>} : vector<16x128xbf16>, vector<128x256xbf16>, vector<16x256xf32> -> vector<16x256xf32>
    %33 = arith.addf %13, %32 : vector<16x256xf32>
    %c0_22 = arith.constant 0 : index
    %c128 = arith.constant 128 : index
    %34 = vector.load %arg6[%c0_22, %c128] : memref<32x768xbf16, #tpu.memory_space<vmem>>, vector<16x128xbf16>
    %c0_23 = arith.constant 0 : index
    %c384 = arith.constant 384 : index
    %35 = vector.load %arg6[%c0_23, %c384] : memref<32x768xbf16, #tpu.memory_space<vmem>>, vector<16x128xbf16>
    %c0_24 = arith.constant 0 : index
    %c640 = arith.constant 640 : index
    %36 = vector.load %arg6[%c0_24, %c640] : memref<32x768xbf16, #tpu.memory_space<vmem>>, vector<16x128xbf16>
    %cst_25 = arith.constant dense<0.000000e+00> : vector<16x16xf32>
    %37 = tpu.matmul %34, %35, %cst_25 {dimension_numbers = #tpu.dot_dimension_numbers<[1], [1], [0], [0], [0, 0, 1, 0], [], []>} : vector<16x128xbf16>, vector<16x128xbf16>, vector<16x16xf32> -> vector<16x16xf32>
    %cst_26 = arith.constant dense<0xFF800000> : vector<16xf32>
    %38 = vector.multi_reduction <maximumf>, %37, %cst_26 [1] : vector<16x16xf32> to vector<16xf32>
    %39 = vector.shape_cast %38 : vector<16xf32> to vector<16x1xf32>
    %40 = vector.broadcast %39 : vector<16x1xf32> to vector<16x16xf32>
    %41 = arith.subf %37, %40 : vector<16x16xf32>
    %42 = math.exp %41 : vector<16x16xf32>
    %cst_27 = arith.constant dense<0.000000e+00> : vector<16xf32>
    %43 = vector.multi_reduction <add>, %42, %cst_27 [1] : vector<16x16xf32> to vector<16xf32>
    %44 = vector.shape_cast %43 : vector<16xf32> to vector<16x1xf32>
    %45 = tpu.reciprocal %44 {approx = true} : vector<16x1xf32> -> vector<16x1xf32>
    %46 = vector.broadcast %45 : vector<16x1xf32> to vector<16x16xf32>
    %47 = arith.mulf %42, %46 : vector<16x16xf32>
    %48 = arith.truncf %47 : vector<16x16xf32> to vector<16x16xbf16>
    %cst_28 = arith.constant dense<0.000000e+00> : vector<16x128xf32>
    %49 = tpu.matmul %48, %36, %cst_28 {dimension_numbers = #tpu.dot_dimension_numbers<[1], [0], [0], [1], [0, 0, 1, 1], [], []>} : vector<16x16xbf16>, vector<16x128xbf16>, vector<16x128xf32> -> vector<16x128xf32>
    %50 = arith.truncf %49 : vector<16x128xf32> to vector<16x128xbf16>
    %c128_29 = arith.constant 128 : index
    %c0_30 = arith.constant 0 : index
    %51 = vector.load %arg3[%c128_29, %c0_30] : memref<256x256xbf16, #tpu.memory_space<vmem>>, vector<128x256xbf16>
    %cst_31 = arith.constant dense<0.000000e+00> : vector<16x256xf32>
    %52 = tpu.matmul %50, %51, %cst_31 {dimension_numbers = #tpu.dot_dimension_numbers<[1], [0], [0], [1], [0, 0, 1, 1], [], []>} : vector<16x128xbf16>, vector<128x256xbf16>, vector<16x256xf32> -> vector<16x256xf32>
    %53 = arith.addf %33, %52 : vector<16x256xf32>
    %54 = vector.broadcast %12 : vector<1x256xf32> to vector<16x256xf32>
    %55 = arith.addf %53, %54 : vector<16x256xf32>
    %c0_32 = arith.constant 0 : index
    %c0_33 = arith.constant 0 : index
    %56 = vector.load %arg5[%c0_32, %c0_33] : memref<32x256xf32, #tpu.memory_space<vmem>>, vector<16x256xf32>
    tpu.vector_store %arg5[%c0_32, %c0_33], %55 {strides = array<i32>} : memref<32x256xf32, #tpu.memory_space<vmem>>, vector<16x256xf32>,
    %cst_34 = arith.constant 0.000000e+00 : f32
    %57 = vector.broadcast %cst_34 : f32 to vector<16x256xf32>
    %c16 = arith.constant 16 : index
    %c0_35 = arith.constant 0 : index
    %58 = vector.load %arg6[%c16, %c0_35] : memref<32x768xbf16, #tpu.memory_space<vmem>>, vector<16x128xbf16>
    %c16_36 = arith.constant 16 : index
    %c256_37 = arith.constant 256 : index
    %59 = vector.load %arg6[%c16_36, %c256_37] : memref<32x768xbf16, #tpu.memory_space<vmem>>, vector<16x128xbf16>
    %c16_38 = arith.constant 16 : index
    %c512_39 = arith.constant 512 : index
    %60 = vector.load %arg6[%c16_38, %c512_39] : memref<32x768xbf16, #tpu.memory_space<vmem>>, vector<16x128xbf16>
    %cst_40 = arith.constant dense<0.000000e+00> : vector<16x16xf32>
    %61 = tpu.matmul %58, %59, %cst_40 {dimension_numbers = #tpu.dot_dimension_numbers<[1], [1], [0], [0], [0, 0, 1, 0], [], []>} : vector<16x128xbf16>, vector<16x128xbf16>, vector<16x16xf32> -> vector<16x16xf32>
    %cst_41 = arith.constant dense<0xFF800000> : vector<16xf32>
    %62 = vector.multi_reduction <maximumf>, %61, %cst_41 [1] : vector<16x16xf32> to vector<16xf32>
    %63 = vector.shape_cast %62 : vector<16xf32> to vector<16x1xf32>
    %64 = vector.broadcast %63 : vector<16x1xf32> to vector<16x16xf32>
    %65 = arith.subf %61, %64 : vector<16x16xf32>
    %66 = math.exp %65 : vector<16x16xf32>
    %cst_42 = arith.constant dense<0.000000e+00> : vector<16xf32>
    %67 = vector.multi_reduction <add>, %66, %cst_42 [1] : vector<16x16xf32> to vector<16xf32>
    %68 = vector.shape_cast %67 : vector<16xf32> to vector<16x1xf32>
    %69 = tpu.reciprocal %68 {approx = true} : vector<16x1xf32> -> vector<16x1xf32>
    %70 = vector.broadcast %69 : vector<16x1xf32> to vector<16x16xf32>
    %71 = arith.mulf %66, %70 : vector<16x16xf32>
    %72 = arith.truncf %71 : vector<16x16xf32> to vector<16x16xbf16>
    %cst_43 = arith.constant dense<0.000000e+00> : vector<16x128xf32>
    %73 = tpu.matmul %72, %60, %cst_43 {dimension_numbers = #tpu.dot_dimension_numbers<[1], [0], [0], [1], [0, 0, 1, 1], [], []>} : vector<16x16xbf16>, vector<16x128xbf16>, vector<16x128xf32> -> vector<16x128xf32>
    %74 = arith.truncf %73 : vector<16x128xf32> to vector<16x128xbf16>
    %c0_44 = arith.constant 0 : index
    %c0_45 = arith.constant 0 : index
    %75 = vector.load %arg3[%c0_44, %c0_45] : memref<256x256xbf16, #tpu.memory_space<vmem>>, vector<128x256xbf16>
    %cst_46 = arith.constant dense<0.000000e+00> : vector<16x256xf32>
    %76 = tpu.matmul %74, %75, %cst_46 {dimension_numbers = #tpu.dot_dimension_numbers<[1], [0], [0], [1], [0, 0, 1, 1], [], []>} : vector<16x128xbf16>, vector<128x256xbf16>, vector<16x256xf32> -> vector<16x256xf32>
    %77 = arith.addf %57, %76 : vector<16x256xf32>
    %c16_47 = arith.constant 16 : index
    %c128_48 = arith.constant 128 : index
    %78 = vector.load %arg6[%c16_47, %c128_48] : memref<32x768xbf16, #tpu.memory_space<vmem>>, vector<16x128xbf16>
    %c16_49 = arith.constant 16 : index
    %c384_50 = arith.constant 384 : index
    %79 = vector.load %arg6[%c16_49, %c384_50] : memref<32x768xbf16, #tpu.memory_space<vmem>>, vector<16x128xbf16>
    %c16_51 = arith.constant 16 : index
    %c640_52 = arith.constant 640 : index
    %80 = vector.load %arg6[%c16_51, %c640_52] : memref<32x768xbf16, #tpu.memory_space<vmem>>, vector<16x128xbf16>
    %cst_53 = arith.constant dense<0.000000e+00> : vector<16x16xf32>
    %81 = tpu.matmul %78, %79, %cst_53 {dimension_numbers = #tpu.dot_dimension_numbers<[1], [1], [0], [0], [0, 0, 1, 0], [], []>} : vector<16x128xbf16>, vector<16x128xbf16>, vector<16x16xf32> -> vector<16x16xf32>
    %cst_54 = arith.constant dense<0xFF800000> : vector<16xf32>
    %82 = vector.multi_reduction <maximumf>, %81, %cst_54 [1] : vector<16x16xf32> to vector<16xf32>
    %83 = vector.shape_cast %82 : vector<16xf32> to vector<16x1xf32>
    %84 = vector.broadcast %83 : vector<16x1xf32> to vector<16x16xf32>
    %85 = arith.subf %81, %84 : vector<16x16xf32>
    %86 = math.exp %85 : vector<16x16xf32>
    %cst_55 = arith.constant dense<0.000000e+00> : vector<16xf32>
    %87 = vector.multi_reduction <add>, %86, %cst_55 [1] : vector<16x16xf32> to vector<16xf32>
    %88 = vector.shape_cast %87 : vector<16xf32> to vector<16x1xf32>
    %89 = tpu.reciprocal %88 {approx = true} : vector<16x1xf32> -> vector<16x1xf32>
    %90 = vector.broadcast %89 : vector<16x1xf32> to vector<16x16xf32>
    %91 = arith.mulf %86, %90 : vector<16x16xf32>
    %92 = arith.truncf %91 : vector<16x16xf32> to vector<16x16xbf16>
    %cst_56 = arith.constant dense<0.000000e+00> : vector<16x128xf32>
    %93 = tpu.matmul %92, %80, %cst_56 {dimension_numbers = #tpu.dot_dimension_numbers<[1], [0], [0], [1], [0, 0, 1, 1], [], []>} : vector<16x16xbf16>, vector<16x128xbf16>, vector<16x128xf32> -> vector<16x128xf32>
    %94 = arith.truncf %93 : vector<16x128xf32> to vector<16x128xbf16>
    %c128_57 = arith.constant 128 : index
    %c0_58 = arith.constant 0 : index
    %95 = vector.load %arg3[%c128_57, %c0_58] : memref<256x256xbf16, #tpu.memory_space<vmem>>, vector<128x256xbf16>
    %cst_59 = arith.constant dense<0.000000e+00> : vector<16x256xf32>
    %96 = tpu.matmul %94, %95, %cst_59 {dimension_numbers = #tpu.dot_dimension_numbers<[1], [0], [0], [1], [0, 0, 1, 1], [], []>} : vector<16x128xbf16>, vector<128x256xbf16>, vector<16x256xf32> -> vector<16x256xf32>
    %97 = arith.addf %77, %96 : vector<16x256xf32>
    %98 = vector.broadcast %12 : vector<1x256xf32> to vector<16x256xf32>
    %99 = arith.addf %97, %98 : vector<16x256xf32>
    %c16_60 = arith.constant 16 : index
    %c0_61 = arith.constant 0 : index
    %100 = vector.load %arg5[%c16_60, %c0_61] : memref<32x256xf32, #tpu.memory_space<vmem>>, vector<16x256xf32>
    tpu.vector_store %arg5[%c16_60, %c0_61], %99 {strides = array<i32>} : memref<32x256xf32, #tpu.memory_space<vmem>>, vector<16x256xf32>,
    return
  }
  func.func @transform_0(%arg0: i32) -> (i32, i32) {
    %c0_i32 = arith.constant 0 : i32
    %c0_i32_0 = arith.constant 0 : i32
    return %arg0, %c0_i32 : i32, i32
  }
  func.func @transform_1(%arg0: i32) -> (i32, i32) {
    %c0_i32 = arith.constant 0 : i32
    %c0_i32_0 = arith.constant 0 : i32
    %c0_i32_1 = arith.constant 0 : i32
    return %c0_i32, %c0_i32_0 : i32, i32
  }
  func.func @transform_2(%arg0: i32) -> (i32, i32) {
    %c0_i32 = arith.constant 0 : i32
    %c0_i32_0 = arith.constant 0 : i32
    %c0_i32_1 = arith.constant 0 : i32
    return %c0_i32, %c0_i32_0 : i32, i32
  }
  func.func @transform_3(%arg0: i32) -> (i32, i32) {
    %c0_i32 = arith.constant 0 : i32
    %c0_i32_0 = arith.constant 0 : i32
    %c0_i32_1 = arith.constant 0 : i32
    return %c0_i32, %c0_i32_0 : i32, i32
  }
  func.func @transform_4(%arg0: i32) -> (i32, i32) {
    %c0_i32 = arith.constant 0 : i32
    %c0_i32_0 = arith.constant 0 : i32
    return %arg0, %c0_i32 : i32, i32
  }
}

</mosaic_0001>

<bundles_post_ra>
// kernel: tpu_custom_call.1
= control target key start
LH: loop header
LB: loop body
LE: loop exit
PB: predicated region body
PF: predicated region fallthrough
CT: control target
= control target key end

     0   :  { %9 = vsyncpa [#allocation4], 0  ;;  %s2760_s0 = inlined_call_operand.hbm [shape: f32[32,256], index: 0, kind: input, shape index: {}]   ;;  %s2761_s1 = inlined_call_operand.hbm [shape: bf16[256,768], index: 1, kind: input, shape index: {}]   ;;  %s2762_s2 = inlined_call_operand.hbm [shape: bf16[256,256], index: 2, kind: input, shape index: {}]   ;;  %s2763_s3 = inlined_call_operand.vmem [shape: f32[1,256], index: 3, kind: input, shape index: {}]   ;;  %s2764_s4 = inlined_call_operand.hbm [shape: f32[32,256], index: 4, kind: output, shape index: {}]  }
   0x1   :  { %10 = vsyncpa [#allocation7], 0 }
   0x2   :  { %11 = vsyncpa [#allocation5], 0  ;;  %s2457_s15 = smov [#allocation6]   ;;  %s2363_s19 = scalar_lea.hbm %s2761_s1, 12288 }
   0x3   :  { %s29_s16 = sshll.u32 %s2457_s15, 4  ;;  %p2364_p0 = scmp.ne.s32.totalorder %s2761_s1, %s2363_s19  ;;  %s30_s16 = int_to_ptr.vmem [resolvable:$true] %s29_s16 }
   0x4   :  { %p2367_p1 = scmp.lt.u32.totalorder %s2363_s19, %s2761_s1 }
   0x6   :  { %p2369_p2 = pnand %p2367_p1, %p2364_p0 }
   0x8   :  { %2372 = shalt.err (!%p2369_p2)
}
   0x9   :  { %s2373_s24 = scalar_lea.vmem %s30_s16, 12288  ;;  %p2378_p4 = scmp.lt.s32.totalorder %s30_s16, %s30_s16 }
   0xa   :  { %p2374_p3 = scmp.ne.s32.totalorder %s30_s16, %s2373_s24  ;;  %p2379_p5 = scmp.lt.s32.totalorder %s2373_s24, %s2373_s24 }
   0xc   :  { %p2380_p6 = por %p2379_p5, %p2378_p4 }
   0xe   :  { %p2381_p7 = pnand %p2380_p6, %p2374_p3 }
  0x10   :  { %2384 = shalt.err (!%p2381_p7)
}
  0x11   :  { %s2458_s25 = smov 384   ;;  %s2459_s26 = smov 24  }
  0x12   :  { %35 = dma.hbm_to_vmem [thread:$0]  %s2761_s1, 12288, %s30_s16, [#allocation7], %s2458_s25, %s2458_s25, %s2459_s26  }
  0x13   :  { %s2460_s29 = smov [#allocation3]   ;;  %s2385_s7 = scalar_lea.hbm %s2760_s0, 1024 }
  0x14   :  { %s17_s30 = sshll.u32 %s2460_s29, 4  ;;  %p2386_p8 = scmp.ne.s32.totalorder %s2760_s0, %s2385_s7  ;;  %s18_s30 = int_to_ptr.vmem [resolvable:$true] %s17_s30 }
  0x15   :  { %p2389_p9 = scmp.lt.u32.totalorder %s2385_s7, %s2760_s0 }
  0x17   :  { %p2391_p10 = pnand %p2389_p9, %p2386_p8 }
  0x19   :  { %2394 = shalt.err (!%p2391_p10)
}
  0x1a   :  { %s2395_s12 = scalar_lea.vmem %s18_s30, 1024  ;;  %p2400_p12 = scmp.lt.s32.totalorder %s18_s30, %s18_s30 }
  0x1b   :  { %p2396_p11 = scmp.ne.s32.totalorder %s18_s30, %s2395_s12  ;;  %p2401_p13 = scmp.lt.s32.totalorder %s2395_s12, %s2395_s12 }
  0x1d   :  { %p2402_p0 = por %p2401_p13, %p2400_p12 }
  0x1f   :  { %p2403_p1 = pnand %p2402_p0, %p2396_p11 }
  0x21   :  { %2406 = shalt.err (!%p2403_p1)
}
  0x22   :  { %s2461_s1 = smov 256   ;;  %s2462_s13 = smov 16  }
  0x23   :  { %23 = dma.hbm_to_vmem [thread:$0]  %s2760_s0, 1024, %s18_s30, [#allocation4], %s2461_s1, %s2461_s1, %s2462_s13  }
  0x24   :  { %s2463_s16 = smov [#allocation8]   ;;  %s2407_s20 = scalar_lea.hbm %s2762_s2, 4096 }
  0x25   :  { %s41_s17 = sshll.u32 %s2463_s16, 4  ;;  %p2408_p2 = scmp.ne.s32.totalorder %s2762_s2, %s2407_s20  ;;  %s42_s17 = int_to_ptr.vmem [resolvable:$true] %s41_s17 }
  0x26   :  { %p2411_p3 = scmp.lt.u32.totalorder %s2407_s20, %s2762_s2 }
  0x28   :  { %p2413_p4 = pnand %p2411_p3, %p2408_p2 }
  0x2a   :  { %2416 = shalt.err (!%p2413_p4)
}
  0x2b   :  { %s2417_s25 = scalar_lea.vmem %s42_s17, 4096  ;;  %p2422_p6 = scmp.lt.s32.totalorder %s42_s17, %s42_s17 }
  0x2c   :  { %p2418_p5 = scmp.ne.s32.totalorder %s42_s17, %s2417_s25  ;;  %p2423_p7 = scmp.lt.s32.totalorder %s2417_s25, %s2417_s25 }
  0x2e   :  { %p2424_p8 = por %p2423_p7, %p2422_p6 }
  0x30   :  { %p2425_p9 = pnand %p2424_p8, %p2418_p5 }
  0x32   :  { %2428 = shalt.err (!%p2425_p9)
}
  0x33   :  { %s2464_s0 = smov 128   ;;  %s2465_s26 = smov 8  }
  0x34   :  { %47 = dma.hbm_to_vmem [thread:$0]  %s2762_s2, 4096, %s42_s17, [#allocation7], %s2464_s0, %s2464_s0, %s2465_s26  }
  0x35   :  { %2451 = dma.done.wait [#allocation4], 1024  }
  0x36   :  { %2452 = vsyncadd [#allocation4], 4294966272 }
  0x37   :  { %2453 = dma.done.wait [#allocation7], 16384  }
  0x38   :  { %2454 = vsyncadd [#allocation7], 4294950912  ;;  %v2139_v0 = vld [vmem:[#allocation6 + $0xc] ss:$24 sps:$4 sm:$0xff]   ;;  %v2141_v1 = vld [vmem:[#allocation6 + $0x8] ss:$24 sps:$4 sm:$0xff]  }
  0x39   :  { %701 = vmatprep.subr.bf16.mxu1 %v2139_v0  ;;  %v2142_v2 = vld [vmem:[#allocation6 + $0x3c] ss:$24 sps:$4 sm:$0xff]   ;;  %v2146_v4 = vld [vmem:[#allocation6 + $0x38] ss:$24 sps:$4 sm:$0xff]   ;;  %v2148_v6 = vld [vmem:[#allocation6 + $0x6c] ss:$24 sps:$4 sm:$0xff]  }
  0x3a   :  { %702 = vmatpush1.bf16.msra.mxu1 %v2141_v1  ;;  %v2144_v3 = vld [vmem:[#allocation6 + $0x4] ss:$24 sps:$4 sm:$0xff]   ;;  %v2147_v5 = vld [vmem:[#allocation6] ss:$24 sps:$4 sm:$0xff]   ;;  %v2150_v7 = vld [vmem:[#allocation6 + $0x34] ss:$24 sps:$4 sm:$0xff]  }
  0x3b   :  { %703 = vmatprep.subr.bf16.mxu1 %v2142_v2  ;;  %648 = vmatprep.subr.bf16.mxu0 %v2144_v3  ;;  %v2153_v8 = vld [vmem:[#allocation6 + $0x30] ss:$24 sps:$4 sm:$0xff]   ;;  %v2154_v10 = vld [vmem:[#allocation6 + $0x9c] ss:$24 sps:$4 sm:$0xff]   ;;  %v2159_v12 = vld [vmem:[#allocation6 + $0x60] ss:$24 sps:$4 sm:$0xff]  }
  0x3c   :  { %649 = vmatpush1.bf16.msra.mxu0 %v2147_v5  ;;  %v2152_v9 = vld [vmem:[#allocation6 + $0x68] ss:$24 sps:$4 sm:$0xff]   ;;  %v2156_v11 = vld [vmem:[#allocation6 + $0x64] ss:$24 sps:$4 sm:$0xff]   ;;  %v2158_v13 = vld [vmem:[#allocation6 + $0x98] ss:$24 sps:$4 sm:$0xff]  }
  0x3d   :  { %650 = vmatprep.subr.bf16.mxu0 %v2150_v7  ;;  %v2162_v14 = vld [vmem:[#allocation6 + $0x94] ss:$24 sps:$4 sm:$0xff]   ;;  %v2164_v16 = vld [vmem:[#allocation6 + $0xc8] ss:$24 sps:$4 sm:$0xff]   ;;  %v2168_v18 = vld [vmem:[#allocation6 + $0xc4] ss:$24 sps:$4 sm:$0xff]  }
  0x3e   :  { %704 = vmatpush1.bf16.msra.mxu1 %v2146_v4  ;;  %v2160_v15 = vld [vmem:[#allocation6 + $0xcc] ss:$24 sps:$4 sm:$0xff]   ;;  %v2165_v17 = vld [vmem:[#allocation6 + $0x90] ss:$24 sps:$4 sm:$0xff]   ;;  %v2166_v19 = vld [vmem:[#allocation6 + $0xfc] ss:$24 sps:$4 sm:$0xff]  }
  0x3f   :  { %705 = vmatprep.subr.bf16.mxu1 %v2148_v6  ;;  %v2171_v20 = vld [vmem:[#allocation6 + $0xc0] ss:$24 sps:$4 sm:$0xff]   ;;  %v2174_v22 = vld [vmem:[#allocation6 + $0xf4] ss:$24 sps:$4 sm:$0xff]   ;;  %v2177_v25 = vld [vmem:[#allocation6 + $0xf0] ss:$24 sps:$4 sm:$0xff]  }
  0x40   :  { %651 = vmatpush1.bf16.msra.mxu0 %v2153_v8  ;;  %v2170_v21 = vld [vmem:[#allocation6 + $0xf8] ss:$24 sps:$4 sm:$0xff]   ;;  %v2172_v23 = vld [vmem:[#allocation6 + $0x12c] ss:$24 sps:$4 sm:$0xff]   ;;  %v2176_v24 = vld [vmem:[#allocation6 + $0x128] ss:$24 sps:$4 sm:$0xff]  }
  0x41   :  { %652 = vmatprep.subr.bf16.mxu0 %v2156_v11  ;;  %v2180_v26 = vld [vmem:[#allocation6 + $0x124] ss:$24 sps:$4 sm:$0xff]   ;;  %v2183_v28 = vld [vmem:[#allocation6 + $0x120] ss:$24 sps:$4 sm:$0xff]   ;;  %v2186_v30 = vld [vmem:[#allocation6 + $0x154] ss:$24 sps:$4 sm:$0xff]  }
  0x42   :  { %706 = vmatpush1.bf16.msra.mxu1 %v2152_v9  ;;  %v2178_v27 = vld [vmem:[#allocation6 + $0x15c] ss:$24 sps:$4 sm:$0xff]   ;;  %v2182_v29 = vld [vmem:[#allocation6 + $0x158] ss:$24 sps:$4 sm:$0xff]   ;;  %v2184_v31 = vld [vmem:[#allocation6 + $0x18c] ss:$24 sps:$4 sm:$0xff]  }
  0x43   :  { %707 = vmatprep.subr.bf16.mxu1 %v2154_v10  ;;  %v2188_v32 = vld [vmem:[#allocation6 + $0x188] ss:$24 sps:$4 sm:$0xff]   ;;  %v2192_v34 = vld [vmem:[#allocation6 + $0x184] ss:$24 sps:$4 sm:$0xff]   ;;  %v2194_v37 = vld [vmem:[#allocation6 + $0x1b8] ss:$24 sps:$4 sm:$0xff]  }
  0x44   :  { %653 = vmatpush1.bf16.msra.mxu0 %v2159_v12  ;;  %v2189_v33 = vld [vmem:[#allocation6 + $0x150] ss:$24 sps:$4 sm:$0xff]   ;;  %v2190_v35 = vld [vmem:[#allocation6 + $0x1bc] ss:$24 sps:$4 sm:$0xff]   ;;  %v2195_v36 = vld [vmem:[#allocation6 + $0x180] ss:$24 sps:$4 sm:$0xff]  }
  0x45   :  { %654 = vmatprep.subr.bf16.mxu0 %v2162_v14  ;;  %v2198_v38 = vld [vmem:[#allocation6 + $0x1b4] ss:$24 sps:$4 sm:$0xff]   ;;  %v2200_v40 = vld [vmem:[#allocation6 + $0x1e8] ss:$24 sps:$4 sm:$0xff]   ;;  %v2204_v42 = vld [vmem:[#allocation6 + $0x1e4] ss:$24 sps:$4 sm:$0xff]  }
  0x46   :  { %708 = vmatpush1.bf16.msra.mxu1 %v2158_v13  ;;  %v2196_v39 = vld [vmem:[#allocation6 + $0x1ec] ss:$24 sps:$4 sm:$0xff]   ;;  %v2201_v41 = vld [vmem:[#allocation6 + $0x1b0] ss:$24 sps:$4 sm:$0xff]   ;;  %v2202_v43 = vld [vmem:[#allocation6 + $0x21c] ss:$24 sps:$4 sm:$0xff]  }
  0x47   :  { %709 = vmatprep.subr.bf16.mxu1 %v2160_v15  ;;  %v61_v44 = vld [vmem:[#allocation3 + $0x8] sm:$0xff]  ;;  %v63_v45 = vld [vmem:[#allocation3 + $0x18] sm:$0xff]  ;;  %v60_v1 = vld [vmem:[#allocation3] sm:$0xff]  ;;  %vm2467_vm0 = vmmov 0   ;;  %vm884_vm1 = vcmask 130048  }
  0x48   :  { %655 = vmatpush1.bf16.msra.mxu0 %v2165_v17  ;;  %v2207_v46 = vld [vmem:[#allocation6 + $0x1e0] ss:$24 sps:$4 sm:$0xff]   ;;  %v2534_v47 = vpack.c.bf16 %v63_v45, %v61_v44  ;;  %v2210_v49 = vld [vmem:[#allocation6 + $0x214] ss:$24 sps:$4 sm:$0xff]   ;;  %v2213_v51 = vld [vmem:[#allocation6 + $0x210] ss:$24 sps:$4 sm:$0xff]  }
  0x49   :  { %656 = vmatprep.subr.bf16.mxu0 %v2168_v18  ;;  %v2206_v48 = vld [vmem:[#allocation6 + $0x218] ss:$24 sps:$4 sm:$0xff]   ;;  %v2208_v50 = vld [vmem:[#allocation6 + $0x24c] ss:$24 sps:$4 sm:$0xff]   ;;  %v2212_v52 = vld [vmem:[#allocation6 + $0x248] ss:$24 sps:$4 sm:$0xff]  }
  0x4a   :  { %710 = vmatpush1.bf16.msra.mxu1 %v2164_v16  ;;  %733 = vmatprep.mubr.bf16.mxu1 %v2534_v47  ;;  %v2216_v53 = vld [vmem:[#allocation6 + $0x244] ss:$24 sps:$4 sm:$0xff]   ;;  %v2219_v55 = vld [vmem:[#allocation6 + $0x240] ss:$24 sps:$4 sm:$0xff]   ;;  %v2222_v57 = vld [vmem:[#allocation6 + $0x274] ss:$24 sps:$4 sm:$0xff]  }
  0x4b   :  { %711 = vmatprep.subr.bf16.mxu1 %v2166_v19  ;;  %680 = vmatprep.mubr.bf16.mxu0 %v2534_v47  ;;  %v2214_v54 = vld [vmem:[#allocation6 + $0x27c] ss:$24 sps:$4 sm:$0xff]   ;;  %v2218_v56 = vld [vmem:[#allocation6 + $0x278] ss:$24 sps:$4 sm:$0xff]   ;;  %v2220_v58 = vld [vmem:[#allocation6 + $0x2ac] ss:$24 sps:$4 sm:$0xff]  }
  0x4c   :  { %657 = vmatpush1.bf16.msra.mxu0 %v2171_v20  ;;  %v2225_v59 = vld [vmem:[#allocation6 + $0x270] ss:$24 sps:$4 sm:$0xff]   ;;  %v2228_v61 = vld [vmem:[#allocation6 + $0x2a4] ss:$24 sps:$4 sm:$0xff]   ;;  %v2231_v0 = vld [vmem:[#allocation6 + $0x2a0] ss:$24 sps:$4 sm:$0xff]  }
  0x4d   :  { %658 = vmatprep.subr.bf16.mxu0 %v2174_v22  ;;  %v2224_v60 = vld [vmem:[#allocation6 + $0x2a8] ss:$24 sps:$4 sm:$0xff]   ;;  %v2226_v62 = vld [vmem:[#allocation6 + $0x2dc] ss:$24 sps:$4 sm:$0xff]   ;;  %v2230_v63 = vld [vmem:[#allocation6 + $0x2d8] ss:$24 sps:$4 sm:$0xff]  }
  0x4e   :  { %712 = vmatpush1.bf16.msra.mxu1 %v2170_v21  ;;  %v62_v2 = vld [vmem:[#allocation3 + $0x10] sm:$0xff]  ;;  %v65_v4 = vld [vmem:[#allocation3 + $0x28] sm:$0xff]  ;;  %v67_v5 = vld [vmem:[#allocation3 + $0x38] sm:$0xff]  ;;  %v2466_v44 = vmov 0.0  }
  0x4f   :  { %713 = vmatprep.subr.bf16.mxu1 %v2172_v23  ;;  %v2232_v3 = vld [vmem:[#allocation6 + $0x2d4] ss:$24 sps:$4 sm:$0xff]   ;;  %v2538_v6 = vpack.c.bf16 %v62_v2, %v60_v1  ;;  %v2234_v7 = vld [vmem:[#allocation6 + $0x2d0] ss:$24 sps:$4 sm:$0xff]   ;;  %v2540_v8 = vpack.c.bf16 %v67_v5, %v65_v4  ;;  %v64_v11 = vld [vmem:[#allocation3 + $0x20] sm:$0xff] }
  0x50   :  { %659 = vmatpush1.bf16.msra.mxu0 %v2177_v25  ;;  %v2237_v9 = vld [vmem:[#allocation6 + $0x14] ss:$24 sps:$4 sm:$0xff]   ;;  %v2235_v10 = vld [vmem:[#allocation6 + $0x10] ss:$24 sps:$4 sm:$0xff]   ;;  %v2240_v13 = vld [vmem:[#allocation6 + $0x44] ss:$24 sps:$4 sm:$0xff]  }
  0x51   :  { %660 = vmatprep.subr.bf16.mxu0 %v2180_v26  ;;  %v66_v12 = vld [vmem:[#allocation3 + $0x30] sm:$0xff]  ;;  %v2238_v14 = vld [vmem:[#allocation6 + $0x40] ss:$24 sps:$4 sm:$0xff]   ;;  %v2246_v18 = vld [vmem:[#allocation6 + $0xa4] ss:$24 sps:$4 sm:$0xff]  }
  0x52   :  { %714 = vmatpush1.bf16.msra.mxu1 %v2176_v24  ;;  %v2243_v15 = vld [vmem:[#allocation6 + $0x74] ss:$24 sps:$4 sm:$0xff]   ;;  %v2545_v16 = vpack.c.bf16 %v66_v12, %v64_v11  ;;  %v2241_v17 = vld [vmem:[#allocation6 + $0x70] ss:$24 sps:$4 sm:$0xff]   ;;  %v2244_v19 = vld [vmem:[#allocation6 + $0xa0] ss:$24 sps:$4 sm:$0xff]  }
  0x53   :  { %715 = vmatprep.subr.bf16.mxu1 %v2178_v27  ;;  %v2249_v20 = vld [vmem:[#allocation6 + $0xd4] ss:$24 sps:$4 sm:$0xff]   ;;  %v2247_v21 = vld [vmem:[#allocation6 + $0xd0] ss:$24 sps:$4 sm:$0xff]   ;;  %v2252_v22 = vld [vmem:[#allocation6 + $0x104] ss:$24 sps:$4 sm:$0xff]  }
  0x54   :  { %661 = vmatpush1.bf16.msra.mxu0 %v2183_v28  ;;  %v2250_v23 = vld [vmem:[#allocation6 + $0x100] ss:$24 sps:$4 sm:$0xff]   ;;  %v2255_v24 = vld [vmem:[#allocation6 + $0x134] ss:$24 sps:$4 sm:$0xff]   ;;  %v2253_v25 = vld [vmem:[#allocation6 + $0x130] ss:$24 sps:$4 sm:$0xff]  }
  0x55   :  { %662 = vmatprep.subr.bf16.mxu0 %v2186_v30  ;;  %v2258_v26 = vld [vmem:[#allocation6 + $0x164] ss:$24 sps:$4 sm:$0xff]   ;;  %v2256_v27 = vld [vmem:[#allocation6 + $0x160] ss:$24 sps:$4 sm:$0xff]   ;;  %v2261_v28 = vld [vmem:[#allocation6 + $0x194] ss:$24 sps:$4 sm:$0xff]  }
  0x56   :  { %716 = vmatpush1.bf16.msra.mxu1 %v2182_v29  ;;  %v2259_v29 = vld [vmem:[#allocation6 + $0x190] ss:$24 sps:$4 sm:$0xff]   ;;  %v2264_v30 = vld [vmem:[#allocation6 + $0x1c4] ss:$24 sps:$4 sm:$0xff]  }
  0x57   :  { %717 = vmatprep.subr.bf16.mxu1 %v2184_v31  ;;  %v2262_v31 = vld [vmem:[#allocation6 + $0x1c0] ss:$24 sps:$4 sm:$0xff]  }
  0x58   :  { %663 = vmatpush1.bf16.msra.mxu0 %v2189_v33  ;;  %v2265_v33 = vld [vmem:[#allocation6 + $0x1f0] ss:$24 sps:$4 sm:$0xff]  }
  0x59   :  { %664 = vmatprep.subr.bf16.mxu0 %v2192_v34  ;;  %v2270_v34 = vld [vmem:[#allocation6 + $0x224] ss:$24 sps:$4 sm:$0xff]  }
  0x5a   :  { %718 = vmatpush1.bf16.msra.mxu1 %v2188_v32  ;;  %v2267_v32 = vld [vmem:[#allocation6 + $0x1f4] ss:$24 sps:$4 sm:$0xff]  }
  0x5b   :  { %719 = vmatprep.subr.bf16.mxu1 %v2190_v35  ;;  %v2268_v35 = vld [vmem:[#allocation6 + $0x220] ss:$24 sps:$4 sm:$0xff]  }
  0x5c   :  { %665 = vmatpush1.bf16.msra.mxu0 %v2195_v36  ;;  %v2273_v36 = vld [vmem:[#allocation6 + $0x254] ss:$24 sps:$4 sm:$0xff]  }
  0x5d   :  { %666 = vmatprep.subr.bf16.mxu0 %v2198_v38  ;;  %v2276_v38 = vld [vmem:[#allocation6 + $0x284] ss:$24 sps:$4 sm:$0xff]  }
  0x5e   :  { %720 = vmatpush1.bf16.msra.mxu1 %v2194_v37  ;;  %v2271_v37 = vld [vmem:[#allocation6 + $0x250] ss:$24 sps:$4 sm:$0xff]  }
  0x5f   :  { %721 = vmatprep.subr.bf16.mxu1 %v2196_v39  ;;  %v2274_v39 = vld [vmem:[#allocation6 + $0x280] ss:$24 sps:$4 sm:$0xff]  }
  0x60   :  { %667 = vmatpush1.bf16.msra.mxu0 %v2201_v41  ;;  %v2277_v41 = vld [vmem:[#allocation6 + $0x2b0] ss:$24 sps:$4 sm:$0xff]  }
  0x61   :  { %668 = vmatprep.subr.bf16.mxu0 %v2204_v42  ;;  %v2282_v42 = vld [vmem:[#allocation6 + $0x2e4] ss:$24 sps:$4 sm:$0xff]  }
  0x62   :  { %722 = vmatpush1.bf16.msra.mxu1 %v2200_v40  ;;  %v2279_v40 = vld [vmem:[#allocation6 + $0x2b4] ss:$24 sps:$4 sm:$0xff]  }
  0x63   :  { %723 = vmatprep.subr.bf16.mxu1 %v2202_v43  ;;  %v2280_v43 = vld [vmem:[#allocation6 + $0x2e0] ss:$24 sps:$4 sm:$0xff]  }
  0x64   :  { %669 = vmatpush1.bf16.msra.mxu0 %v2207_v46 }
  0x65   :  { %670 = vmatprep.subr.bf16.mxu0 %v2210_v49 }
  0x66   :  { %724 = vmatpush1.bf16.msra.mxu1 %v2206_v48 }
  0x67   :  { %725 = vmatprep.subr.bf16.mxu1 %v2208_v50 }
  0x68   :  { %671 = vmatpush1.bf16.msra.mxu0 %v2213_v51 }
  0x69   :  { %672 = vmatprep.subr.bf16.mxu0 %v2216_v53 }
  0x6a   :  { %726 = vmatpush1.bf16.msra.mxu1 %v2212_v52 }
  0x6b   :  { %727 = vmatprep.subr.bf16.mxu1 %v2214_v54 }
  0x6c   :  { %673 = vmatpush1.bf16.msra.mxu0 %v2219_v55 }
  0x6d   :  { %674 = vmatprep.subr.bf16.mxu0 %v2222_v57 }
  0x6e   :  { %728 = vmatpush1.bf16.msra.mxu1 %v2218_v56 }
  0x6f   :  { %729 = vmatprep.subr.bf16.mxu1 %v2220_v58 }
  0x70   :  { %675 = vmatpush1.bf16.msra.mxu0 %v2225_v59 }
  0x71   :  { %676 = vmatprep.subr.bf16.mxu0 %v2228_v61 }
  0x72   :  { %730 = vmatpush1.bf16.msra.mxu1 %v2224_v60 }
  0x73   :  { %731 = vmatprep.subr.bf16.mxu1 %v2226_v62 }
  0x74   :  { %677 = vmatpush1.bf16.msra.mxu0 %v2231_v0 }
  0x75   :  { %678 = vmatprep.subr.bf16.mxu0 %v2232_v3 }
  0x76   :  { %732 = vmatpush1.bf16.msra.mxu1 %v2230_v63 }
  0x77   :  { %2070 = vmatprep.subr.bf16.mxu1 %v2466_v44 }
  0x78   :  { %679 = vmatpush1.bf16.msra.mxu0 %v2234_v7 }
  0x79   :  { %734 = vmatmul.mubr.bf16.vlgmr.msra.gmra.mrb[0].mxu1 %v2538_v6  ;;  %754 = vmatprep.subr.bf16.mxu0 %v2237_v9 }
  0x7a   :  { %743 = vmatprep.mubr.bf16.mxu1 %v2540_v8 }
  0x7b   :  { %681 = vmatmul.mubr.bf16.vlgmr.msra.gmra.mrb[0].mxu0 %v2538_v6 }
  0x7c   :  { %690 = vmatprep.mubr.bf16.mxu0 %v2540_v8  ;;  %755 = vmatpush1.bf16.msra.mxu0 %v2235_v10 }
  0x7d   :  { %756 = vmatprep.subr.bf16.mxu0 %v2240_v13 }
  0x80   :  { %757 = vmatpush1.bf16.msra.mxu0 %v2238_v14 }
  0x81   :  { %744 = vmatmul.mubr.bf16.gmra.mrb[4].mxu1 %v2545_v16  ;;  %758 = vmatprep.subr.bf16.mxu0 %v2243_v15 }
  0x82   :  { %2072 = vmatprep.mubr.msk.bf16.mxu1 %vm2467_vm0, %v2466_v44 }
  0x83   :  { %691 = vmatmul.mubr.bf16.gmra.mrb[4].mxu0 %v2545_v16 }
  0x84   :  { %759 = vmatpush1.bf16.msra.mxu0 %v2241_v17  ;;  %786 = vmatprep.mubr.bf16.mxu0 %v2534_v47 }
  0x85   :  { %760 = vmatprep.subr.bf16.mxu0 %v2246_v18 }
  0x88   :  { %761 = vmatpush1.bf16.msra.mxu0 %v2244_v19 }
  0x89   :  { %762 = vmatprep.subr.bf16.mxu0 %v2249_v20 }
  0x8c   :  { %763 = vmatpush1.bf16.msra.mxu0 %v2247_v21 }
  0x8d   :  { %764 = vmatprep.subr.bf16.mxu0 %v2252_v22 }
  0x90   :  { %765 = vmatpush1.bf16.msra.mxu0 %v2250_v23 }
  0x91   :  { %766 = vmatprep.subr.bf16.mxu0 %v2255_v24 }
  0x94   :  { %767 = vmatpush1.bf16.msra.mxu0 %v2253_v25 }
  0x95   :  { %768 = vmatprep.subr.bf16.mxu0 %v2258_v26 }
  0x98   :  { %769 = vmatpush1.bf16.msra.mxu0 %v2256_v27 }
  0x99   :  { %770 = vmatprep.subr.bf16.mxu0 %v2261_v28 }
  0x9c   :  { %771 = vmatpush1.bf16.msra.mxu0 %v2259_v29 }
  0x9d   :  { %772 = vmatprep.subr.bf16.mxu0 %v2264_v30 }
  0xa0   :  { %773 = vmatpush1.bf16.msra.mxu0 %v2262_v31 }
  0xa1   :  { %774 = vmatprep.subr.bf16.mxu0 %v2267_v32 }
  0xa4   :  { %775 = vmatpush1.bf16.msra.mxu0 %v2265_v33 }
  0xa5   :  { %776 = vmatprep.subr.bf16.mxu0 %v2270_v34 }
  0xa8   :  { %777 = vmatpush1.bf16.msra.mxu0 %v2268_v35 }
  0xa9   :  { %778 = vmatprep.subr.bf16.mxu0 %v2273_v36 }
  0xac   :  { %779 = vmatpush1.bf16.msra.mxu0 %v2271_v37 }
  0xad   :  { %780 = vmatprep.subr.bf16.mxu0 %v2276_v38 }
  0xb0   :  { %781 = vmatpush1.bf16.msra.mxu0 %v2274_v39 }
  0xb1   :  { %782 = vmatprep.subr.bf16.mxu0 %v2279_v40 }
  0xb4   :  { %783 = vmatpush1.bf16.msra.mxu0 %v2277_v41 }
  0xb5   :  { %784 = vmatprep.subr.bf16.mxu0 %v2282_v42 }
  0xb8   :  { %785 = vmatpush1.bf16.msra.mxu0 %v2280_v43 }
  0xb9   :  { %2094 = vmatprep.subr.bf16.mxu0 %v2466_v44 }
  0xbb   :  { %787 = vmatmul.mubr.bf16.vlgmr.msra.gmra.mrb[8].mxu0 %v2538_v6 }
  0xbc   :  { %796 = vmatprep.mubr.bf16.mxu0 %v2540_v8 }
  0xc3   :  { %797 = vmatmul.mubr.bf16.gmra.mrb[12].mxu0 %v2545_v16 }
  0xc4   :  { %2096 = vmatprep.mubr.msk.bf16.mxu0 %vm2467_vm0, %v2466_v44 }
 0x14c   :  { %v735_v45 = vpop.f32.mrb[0].mxu1 }
 0x14d   :  { %v2560_v46 = vpop.f32.mrb[1].mxu1 }
 0x14e   :  { %v739_v47 = vpop.f32.mrb[2].mxu1  ;;  %v682_v50 = vpop.f32.mrb[0].mxu0 }
 0x14f   :  { %v823_v48 = vpack.c.bf16 %v739_v47, %v735_v45  ;;  %v2562_v49 = vpop.f32.mrb[3].mxu1  ;;  %v807_v52 = vmul.f32 0.088388346, %v682_v50  ;;  %v684_v53 = vpop.f32.mrb[1].mxu0 }
 0x150   :  { %v824_v51 = vpack.c.bf16 %v2562_v49, %v2560_v46  ;;  %v2566_v54 = vmul.f32 0.088388346, %v684_v53  ;;  %v686_v55 = vpop.f32.mrb[2].mxu0 }
 0x151   :  { %2071 = vmatpush3.bf16.xpose.msra.mxu1 %v823_v48  ;;  %v809_v56 = vmul.f32 0.088388346, %v686_v55  ;;  %v688_v57 = vpop.f32.mrb[3].mxu0 }
 0x152   :  { %2076 = vmatprep.subr.bf16.mxu1 %v2466_v44  ;;  %v2569_v58 = vmul.f32 0.088388346, %v688_v57 }
 0x153   :  { %v815_v59 = vpack.c.bf16 %v809_v56, %v807_v52 }
 0x154   :  { %v745_v60 = vpop.f32.mrb[4].mxu1  ;;  %v816_v62 = vpack.c.bf16 %v2569_v58, %v2566_v54 }
 0x155   :  { %v2571_v61 = vpop.f32.mrb[5].mxu1 }
 0x156   :  { %v749_v63 = vpop.f32.mrb[6].mxu1  ;;  %v692_v1 = vpop.f32.mrb[4].mxu0 }
 0x157   :  { %v827_v0 = vpack.c.bf16 %v749_v63, %v745_v60  ;;  %v2575_v2 = vpop.f32.mrb[7].mxu1  ;;  %v811_v3 = vmul.f32 0.088388346, %v692_v1  ;;  %v694_v4 = vpop.f32.mrb[5].mxu0 }
 0x158   :  { %2073 = vmatmul.mubr.bf16.vlgmr.msra.gmra.mrb[8].mxu1 %v815_v59  ;;  %v828_v5 = vpack.c.bf16 %v2575_v2, %v2571_v61  ;;  %v2579_v6 = vmul.f32 0.088388346, %v694_v4  ;;  %v696_v7 = vpop.f32.mrb[6].mxu0 }
 0x159   :  { %2095 = vmatpush3.bf16.xpose.msra.mxu0 %v827_v0  ;;  %2078 = vmatprep.mubr.msk.bf16.mxu1 %vm2467_vm0, %v2466_v44  ;;  %v813_v8 = vmul.f32 0.088388346, %v696_v7  ;;  %v698_v9 = vpop.f32.mrb[7].mxu0 }
 0x15a   :  { %2100 = vmatprep.subr.bf16.mxu0 %v2466_v44  ;;  %v2584_v10 = vmul.f32 0.088388346, %v698_v9 }
 0x15b   :  { %v817_v11 = vpack.c.bf16 %v813_v8, %v811_v3 }
 0x15c   :  { %v818_v12 = vpack.c.bf16 %v2584_v10, %v2579_v6 }
 0x160   :  { %2097 = vmatmul.mubr.bf16.vlgmr.msra.gmra.mrb[16].mxu0 %v817_v11 }
 0x161   :  { %2102 = vmatprep.mubr.msk.bf16.mxu0 %vm2467_vm0, %v2466_v44 }
 0x18e   :  { %v788_v13 = vpop.f32.mrb[8].mxu0 }
 0x18f   :  { %v2590_v14 = vpop.f32.mrb[9].mxu0 }
 0x190   :  { %v792_v15 = vpop.f32.mrb[10].mxu0 }
 0x191   :  { %v825_v16 = vpack.c.bf16 %v792_v15, %v788_v13  ;;  %v2592_v17 = vpop.f32.mrb[11].mxu0 }
 0x192   :  { %v826_v18 = vpack.c.bf16 %v2592_v17, %v2590_v14 }
 0x193   :  { %2077 = vmatpush3.bf16.msra.mxu1 %v825_v16 }
 0x194   :  { %2082 = vmatprep.subr.bf16.mxu1 %v2466_v44 }
 0x196   :  { %v798_v19 = vpop.f32.mrb[12].mxu0 }
 0x197   :  { %v2596_v20 = vpop.f32.mrb[13].mxu0 }
 0x198   :  { %v802_v21 = vpop.f32.mrb[14].mxu0 }
 0x199   :  { %v829_v22 = vpack.c.bf16 %v802_v21, %v798_v19  ;;  %v2599_v23 = vpop.f32.mrb[15].mxu0 }
 0x19a   :  { %v830_v24 = vpack.c.bf16 %v2599_v23, %v2596_v20 }
 0x19b   :  { %2101 = vmatpush3.bf16.msra.mxu0 %v829_v22 }
 0x19c   :  { %2106 = vmatprep.subr.bf16.mxu0 %v2466_v44 }
 0x22b   :  { %v877_v25 = vpop.f32.mrb[8].mxu1 }
 0x22c   :  { %v885_v26 = vsel %vm884_vm1, %v877_v25, -inf  ;;  %v2074_v27 = vpop.f32.mrb[9].mxu1 }
 0x22d   :  { %886 = vmax.xlane.f32.xlu0 %v885_v26  ;;  %v880_v28 = vpop.f32.mrb[10].mxu1 }
 0x22e   :  { %v2075_v29 = vpop.f32.mrb[11].mxu1  ;;  %v888_v30 = vsel %vm884_vm1, %v880_v28, -inf }
 0x231   :  { %889 = vmax.xlane.f32.xlu0 %v888_v30 }
 0x233   :  { %v1399_v31 = vpop.f32.mrb[16].mxu0 }
 0x234   :  { %v1406_v32 = vsel %vm884_vm1, %v1399_v31, -inf  ;;  %v2098_v33 = vpop.f32.mrb[17].mxu0 }
 0x235   :  { %1407 = vmax.xlane.f32.xlu1 %v1406_v32  ;;  %v1402_v34 = vpop.f32.mrb[18].mxu0 }
 0x236   :  { %v1409_v35 = vsel %vm884_vm1, %v1402_v34, -inf  ;;  %v2099_v36 = vpop.f32.mrb[19].mxu0 }
 0x239   :  { %1410 = vmax.xlane.f32.xlu1 %v1409_v35 }
 0x2ba   :  { %v887_v37 = vpop.xlane.xlu0 %886 }
 0x2bb   :  { %v891_v38 = vsub.f32 %v877_v25, %v887_v37 }
 0x2bd   :  { %v893_v39 = vmul.f32 1.442695, %v891_v38 }
 0x2be   :  { %v890_v40 = vpop.xlane.xlu0 %889 }
 0x2bf   :  { %2331 = vpow2.f32 %v893_v39  ;;  %v892_v41 = vsub.f32 %v880_v28, %v890_v40 }
 0x2c1   :  { %v895_v42 = vmul.f32 1.442695, %v892_v41 }
 0x2c2   :  { %v1408_v43 = vpop.xlane.xlu1 %1407 }
 0x2c3   :  { %2333 = vpow2.f32 %v895_v42  ;;  %v1412_v45 = vsub.f32 %v1399_v31, %v1408_v43 }
 0x2c5   :  { %v1414_v47 = vmul.f32 1.442695, %v1412_v45 }
 0x2c6   :  { %v1411_v48 = vpop.xlane.xlu1 %1410 }
 0x2c7   :  { %2335 = vpow2.f32 %v1414_v47  ;;  %v1413_v50 = vsub.f32 %v1402_v34, %v1411_v48 }
 0x2c9   :  { %v2332_v52 = vpop.eup %2331  ;;  %v1416_v53 = vmul.f32 1.442695, %v1413_v50 }
 0x2ca   :  { %v897_v55 = vsel %vm884_vm1, %v2332_v52, 0.0 }
 0x2cb   :  { %2337 = vpow2.f32 %v1416_v53  ;;  %898 = vadd.xlane.f32.xlu0 %v897_v55  ;;  %v2662_v53 = vld [vmem:[#allocation8 + $0x4] ss:$8 sps:$4 sm:$0xff]  }
 0x2cc   :  { %v2665_v55 = vld [vmem:[#allocation8 + $0x84] ss:$8 sps:$4 sm:$0xff]  }
 0x2cd   :  { %v2334_v56 = vpop.eup %2333 }
 0x2ce   :  { %v900_v57 = vsel %vm884_vm1, %v2334_v56, 0.0 }
 0x2cf   :  { %901 = vadd.xlane.f32.xlu1 %v900_v57 }
 0x2d1   :  { %v2336_v59 = vpop.eup %2335 }
 0x2d2   :  { %v1418_v60 = vsel %vm884_vm1, %v2336_v59, 0.0 }
 0x2d3   :  { %1419 = vadd.xlane.f32.xlu0 %v1418_v60 }
 0x2d5   :  { %v2338_v63 = vpop.eup %2337 }
 0x2d6   :  { %v1421_v0 = vsel %vm884_vm1, %v2338_v63, 0.0 }
 0x2d7   :  { %1422 = vadd.xlane.f32.xlu1 %v1421_v0 }
 0x358   :  { %v899_v1 = vpop.xlane.xlu0 %898 }
 0x359   :  { %2339 = vrcp.f32 %v899_v1 }
 0x35c   :  { %v902_v3 = vpop.xlane.xlu1 %901 }
 0x35d   :  { %2341 = vrcp.f32 %v902_v3 }
 0x360   :  { %v1420_v4 = vpop.xlane.xlu0 %1419 }
 0x361   :  { %2343 = vrcp.f32 %v1420_v4  ;;  %v2668_v4 = vld [vmem:[#allocation8 + $0x80] ss:$8 sps:$4 sm:$0xff]  }
 0x363   :  { %v2340_v8 = vpop.eup %2339 }
 0x364   :  { %v1423_v7 = vpop.xlane.xlu1 %1422  ;;  %v905_v11 = vmul.f32 %v2340_v8, %v2332_v52  ;;  %v2670_v8 = vld [vmem:[#allocation8 + $0x94] ss:$8 sps:$4 sm:$0xff]  }
 0x365   :  { %2345 = vrcp.f32 %v1423_v7 }
 0x367   :  { %v2342_v9 = vpop.eup %2341 }
 0x368   :  { %v906_v13 = vmul.f32 %v2342_v9, %v2334_v56 }
 0x36a   :  { %v907_v15 = vpack.c.bf16 %v906_v13, %v905_v11  ;;  %v2674_v11 = vld [vmem:[#allocation8 + $0x90] ss:$8 sps:$4 sm:$0xff]   ;;  %v2468_v13 = vmov 0  }
 0x36b   :  { %v2344_v16 = vpop.eup %2343 }
 0x36c   :  { %2079 = vmatmul.mubr.msk.bf16.vlgmr.msra.gmra.mrb[12].mxu1 %vm884_vm1, %v907_v15  ;;  %v1426_v21 = vmul.f32 %v2344_v16, %v2336_v59  ;;  %v2678_v15 = vld [vmem:[#allocation8 + $0xa4] ss:$8 sps:$4 sm:$0xff]  }
 0x36d   :  { %2083 = vmatpush3.bf16.xpose.msra.mxu1 %v824_v51  ;;  %2084 = vmatprep.mubr.msk.bf16.mxu1 %vm2467_vm0, %v2466_v44 }
 0x36e   :  { %2088 = vmatprep.subr.bf16.mxu1 %v2466_v44 }
 0x36f   :  { %v2346_v19 = vpop.eup %2345 }
 0x370   :  { %v1427_v22 = vmul.f32 %v2346_v19, %v2338_v63 }
 0x372   :  { %v1428_v25 = vpack.c.bf16 %v1427_v22, %v1426_v21  ;;  %v2680_v22 = vld [vmem:[#allocation8] ss:$8 sps:$4 sm:$0xff]  }
 0x374   :  { %2085 = vmatmul.mubr.bf16.vlgmr.msra.gmra.mrb[16].mxu1 %v816_v62  ;;  %2103 = vmatmul.mubr.msk.bf16.vlgmr.msra.gmra.mrb[20].mxu0 %vm884_vm1, %v1428_v25 }
 0x375   :  { %2089 = vmatpush3.bf16.msra.mxu1 %v826_v18  ;;  %2107 = vmatpush3.bf16.xpose.msra.mxu0 %v828_v5 }
 0x376   :  { %2108 = vmatprep.mubr.msk.bf16.mxu0 %vm2467_vm0, %v2466_v44  ;;  %2112 = vmatprep.subr.bf16.mxu0 %v2466_v44 }
 0x377   :  { %2090 = vmatprep.mubr.msk.bf16.mxu1 %vm2467_vm0, %v2466_v44  ;;  %1177 = vmatprep.subr.bf16.mxu1 %v2665_v55 }
 0x37c   :  { %2109 = vmatmul.mubr.bf16.vlgmr.msra.gmra.mrb[24].mxu0 %v818_v12 }
 0x37d   :  { %2113 = vmatpush3.bf16.msra.mxu0 %v830_v24  ;;  %2114 = vmatprep.mubr.msk.bf16.mxu0 %vm2467_vm0, %v2466_v44 }
 0x37e   :  { %1821 = vmatprep.subr.bf16.mxu0 %v2662_v53 }
 0x43f   :  { %v2642_v46 = vpop.f32.mrb[12].mxu1 }
 0x440   :  { %v2080_v49 = vpop.f32.mrb[13].mxu1 }
 0x441   :  { %v2644_v51 = vpop.f32.mrb[14].mxu1  ;;  %v2683_v49 = vld [vmem:[#allocation8 + $0x14] ss:$8 sps:$4 sm:$0xff]  }
 0x442   :  { %v952_v54 = vpack.c.bf16 %v2644_v51, %v2642_v46  ;;  %v2081_v58 = vpop.f32.mrb[15].mxu1  ;;  %v1344_v46 = vlaneseq }
 0x443   :  { %v2685_v58 = vld [vmem:[#allocation8 + $0xa0] ss:$8 sps:$4 sm:$0xff]  }
 0x444   :  { %v1345_v51 = vshrl.u32 %v1344_v46, 7 }
 0x447   :  { %v1006_v61 = vpop.f32.mrb[16].mxu1  ;;  %v2648_v62 = vpop.f32.mrb[20].mxu0 }
 0x448   :  { %v2086_v2 = vpop.f32.mrb[17].mxu1  ;;  %v2104_v5 = vpop.f32.mrb[21].mxu0  ;;  %v1013_v6 = vsel %vm884_vm1, %v1006_v61, -inf }
 0x449   :  { %1014 = vmax.xlane.f32.xlu0 %v1013_v6  ;;  %v1009_v10 = vpop.f32.mrb[18].mxu1  ;;  %v2651_v12 = vpop.f32.mrb[22].mxu0  ;;  %v2286_v2 = vld [vmem:[#allocation8 + $0x10] ss:$8 sps:$4 sm:$0xff]   ;;  %v2291_v5 = vld [vmem:[#allocation8 + $0x24] ss:$8 sps:$4 sm:$0xff]  }
 0x44a   :  { %v1473_v44 = vpack.c.bf16 %v2651_v12, %v2648_v62  ;;  %v2087_v14 = vpop.f32.mrb[19].mxu1  ;;  %v2105_v17 = vpop.f32.mrb[23].mxu0  ;;  %v1016_v18 = vsel %vm884_vm1, %v1009_v10, -inf  ;;  %v2695_v6 = vld [vmem:[#allocation8 + $0xb0] ss:$8 sps:$4 sm:$0xff]  }
 0x44b   :  { %1017 = vmax.xlane.f32.xlu1 %v1016_v18  ;;  %v2289_v14 = vld [vmem:[#allocation8 + $0x20] ss:$8 sps:$4 sm:$0xff]   ;;  %v2294_v17 = vld [vmem:[#allocation8 + $0x34] ss:$8 sps:$4 sm:$0xff]  }
 0x44c   :  { %v2701_v18 = vld [vmem:[#allocation8 + $0xc0] ss:$8 sps:$4 sm:$0xff]  }
 0x44f   :  { %v1527_v20 = vpop.f32.mrb[24].mxu0 }
 0x450   :  { %v2110_v23 = vpop.f32.mrb[25].mxu0  ;;  %v1534_v24 = vsel %vm884_vm1, %v1527_v20, -inf }
 0x451   :  { %1535 = vmax.xlane.f32.xlu0 %v1534_v24  ;;  %v1530_v26 = vpop.f32.mrb[26].mxu0  ;;  %v2292_v23 = vld [vmem:[#allocation8 + $0x30] ss:$8 sps:$4 sm:$0xff]   ;;  %v2297_v24 = vld [vmem:[#allocation8 + $0x44] ss:$8 sps:$4 sm:$0xff]  }
 0x452   :  { %v2111_v27 = vpop.f32.mrb[27].mxu0  ;;  %v1537_v28 = vsel %vm884_vm1, %v1530_v26, -inf }
 0x453   :  { %1538 = vmax.xlane.f32.xlu1 %v1537_v28  ;;  %v2710_v27 = vld [vmem:[#allocation8 + $0xe4] ss:$8 sps:$4 sm:$0xff]   ;;  %v2295_v28 = vld [vmem:[#allocation8 + $0x40] ss:$8 sps:$4 sm:$0xff]  }
 0x4d6   :  { %v1015_v29 = vpop.xlane.xlu0 %1014 }
 0x4d7   :  { %v1019_v30 = vsub.f32 %v1006_v61, %v1015_v29  ;;  %v2688_v61 = vld [vmem:[#allocation8 + $0xb4] ss:$8 sps:$4 sm:$0xff]  }
 0x4d8   :  { %v1018_v31 = vpop.xlane.xlu1 %1017  ;;  %v2300_v29 = vld [vmem:[#allocation8 + $0x54] ss:$8 sps:$4 sm:$0xff]  }
 0x4d9   :  { %v1021_v32 = vmul.f32 1.442695, %v1019_v30  ;;  %v1020_v33 = vsub.f32 %v1009_v10, %v1018_v31  ;;  %v2698_v10 = vld [vmem:[#allocation8 + $0xc4] ss:$8 sps:$4 sm:$0xff]   ;;  %v2713_v30 = vld [vmem:[#allocation8 + $0xe0] ss:$8 sps:$4 sm:$0xff]  }
 0x4da   :  { %v2298_v31 = vld [vmem:[#allocation8 + $0x50] ss:$8 sps:$4 sm:$0xff]  }
 0x4db   :  { %2347 = vpow2.f32 %v1021_v32  ;;  %v1023_v34 = vmul.f32 1.442695, %v1020_v33  ;;  %v2303_v32 = vld [vmem:[#allocation8 + $0x64] ss:$8 sps:$4 sm:$0xff]   ;;  %v2301_v33 = vld [vmem:[#allocation8 + $0x60] ss:$8 sps:$4 sm:$0xff]  }
 0x4dd   :  { %2349 = vpow2.f32 %v1023_v34  ;;  %v2306_v34 = vld [vmem:[#allocation8 + $0x74] ss:$8 sps:$4 sm:$0xff]  }
 0x4de   :  { %v1536_v35 = vpop.xlane.xlu0 %1535 }
 0x4df   :  { %v1540_v36 = vsub.f32 %v1527_v20, %v1536_v35  ;;  %v2704_v20 = vld [vmem:[#allocation8 + $0xd4] ss:$8 sps:$4 sm:$0xff]   ;;  %v2304_v35 = vld [vmem:[#allocation8 + $0x70] ss:$8 sps:$4 sm:$0xff]  }
 0x4e0   :  { %v1539_v37 = vpop.xlane.xlu1 %1538 }
 0x4e1   :  { %v1542_v38 = vmul.f32 1.442695, %v1540_v36  ;;  %v1541_v39 = vsub.f32 %v1530_v26, %v1539_v37  ;;  %v2707_v26 = vld [vmem:[#allocation8 + $0xd0] ss:$8 sps:$4 sm:$0xff]   ;;  %v2330_v36 = vld [vmem:[#allocation8 + $0xf4] ss:$8 sps:$4 sm:$0xff]  }
 0x4e2   :  { %v2328_v37 = vld [vmem:[#allocation8 + $0xf0] ss:$8 sps:$4 sm:$0xff]  }
 0x4e3   :  { %2351 = vpow2.f32 %v1542_v38  ;;  %v1544_v40 = vmul.f32 1.442695, %v1541_v39 }
 0x4e5   :  { %v2348_v41 = vpop.eup %2347  ;;  %2353 = vpow2.f32 %v1544_v40 }
 0x4e6   :  { %v1025_v42 = vsel %vm884_vm1, %v2348_v41, 0.0 }
 0x4e7   :  { %v2350_v43 = vpop.eup %2349  ;;  %1026 = vadd.xlane.f32.xlu0 %v1025_v42 }
 0x4e8   :  { %v1028_v45 = vsel %vm884_vm1, %v2350_v43, 0.0 }
 0x4e9   :  { %1029 = vadd.xlane.f32.xlu1 %v1028_v45 }
 0x4ed   :  { %v2352_v47 = vpop.eup %2351 }
 0x4ee   :  { %v1546_v48 = vsel %vm884_vm1, %v2352_v47, 0.0 }
 0x4ef   :  { %v2354_v50 = vpop.eup %2353  ;;  %1547 = vadd.xlane.f32.xlu0 %v1546_v48 }
 0x4f0   :  { %v1549_v52 = vsel %vm884_vm1, %v2354_v50, 0.0 }
 0x4f1   :  { %1550 = vadd.xlane.f32.xlu1 %v1549_v52 }
 0x574   :  { %v1027_v56 = vpop.xlane.xlu0 %1026 }
 0x575   :  { %2355 = vrcp.f32 %v1027_v56 }
 0x576   :  { %v1030_v57 = vpop.xlane.xlu1 %1029 }
 0x577   :  { %2357 = vrcp.f32 %v1030_v57 }
 0x57c   :  { %v1548_v59 = vpop.xlane.xlu0 %1547 }
 0x57d   :  { %2359 = vrcp.f32 %v1548_v59 }
 0x57e   :  { %v1551_v60 = vpop.xlane.xlu1 %1550 }
 0x57f   :  { %v2356_v63 = vpop.eup %2355  ;;  %2361 = vrcp.f32 %v1551_v60 }
 0x580   :  { %v1033_v1 = vmul.f32 %v2356_v63, %v2348_v41 }
 0x581   :  { %v2358_v0 = vpop.eup %2357 }
 0x582   :  { %v1034_v3 = vmul.f32 %v2358_v0, %v2350_v43 }
 0x584   :  { %v1035_v7 = vpack.c.bf16 %v1034_v3, %v1033_v1 }
 0x586   :  { %2091 = vmatmul.mubr.msk.bf16.vlgmr.msra.gmra.mrb[20].mxu1 %vm884_vm1, %v1035_v7 }
 0x587   :  { %v2360_v9 = vpop.eup %2359  ;;  %1178 = vmatpush1.bf16.msra.mxu1 %v2668_v4  ;;  %1209 = vmatprep.mubr.bf16.mxu1 %v2468_v13 }
 0x588   :  { %1179 = vmatprep.subr.bf16.mxu1 %v2670_v8  ;;  %v1554_v19 = vmul.f32 %v2360_v9, %v2352_v47 }
 0x589   :  { %v2362_v16 = vpop.eup %2361 }
 0x58a   :  { %v1555_v21 = vmul.f32 %v2362_v16, %v2354_v50 }
 0x58b   :  { %1180 = vmatpush1.bf16.msra.mxu1 %v2674_v11 }
 0x58c   :  { %v1556_v25 = vpack.c.bf16 %v1555_v21, %v1554_v19  ;;  %1181 = vmatprep.subr.bf16.mxu1 %v2678_v15 }
 0x58e   :  { %2115 = vmatmul.mubr.msk.bf16.vlgmr.msra.gmra.mrb[28].mxu0 %vm884_vm1, %v1556_v25 }
 0x58f   :  { %1822 = vmatpush1.bf16.msra.mxu0 %v2680_v22  ;;  %1853 = vmatprep.mubr.bf16.mxu0 %v2468_v13 }
 0x590   :  { %1823 = vmatprep.subr.bf16.mxu0 %v2683_v49  ;;  %1182 = vmatpush1.bf16.msra.mxu1 %v2685_v58 }
 0x591   :  { %1183 = vmatprep.subr.bf16.mxu1 %v2688_v61 }
 0x593   :  { %1824 = vmatpush1.bf16.msra.mxu0 %v2286_v2 }
 0x594   :  { %1825 = vmatprep.subr.bf16.mxu0 %v2291_v5  ;;  %1184 = vmatpush1.bf16.msra.mxu1 %v2695_v6 }
 0x595   :  { %1185 = vmatprep.subr.bf16.mxu1 %v2698_v10 }
 0x597   :  { %1826 = vmatpush1.bf16.msra.mxu0 %v2289_v14 }
 0x598   :  { %1827 = vmatprep.subr.bf16.mxu0 %v2294_v17  ;;  %1186 = vmatpush1.bf16.msra.mxu1 %v2701_v18 }
 0x599   :  { %1187 = vmatprep.subr.bf16.mxu1 %v2704_v20 }
 0x59b   :  { %1828 = vmatpush1.bf16.msra.mxu0 %v2292_v23 }
 0x59c   :  { %1829 = vmatprep.subr.bf16.mxu0 %v2297_v24  ;;  %1188 = vmatpush1.bf16.msra.mxu1 %v2707_v26 }
 0x59d   :  { %1189 = vmatprep.subr.bf16.mxu1 %v2710_v27 }
 0x59f   :  { %1830 = vmatpush1.bf16.msra.mxu0 %v2295_v28 }
 0x5a0   :  { %1831 = vmatprep.subr.bf16.mxu0 %v2300_v29  ;;  %1190 = vmatpush1.bf16.msra.mxu1 %v2713_v30 }
 0x5a1   :  { %1191 = vmatprep.subr.bf16.mxu1 %v2330_v36 }
 0x5a3   :  { %1832 = vmatpush1.bf16.msra.mxu0 %v2298_v31 }
 0x5a4   :  { %1833 = vmatprep.subr.bf16.mxu0 %v2303_v32  ;;  %1192 = vmatpush1.bf16.msra.mxu1 %v2328_v37 }
 0x5a5   :  { %1300 = vmatprep.subr.bf16.mxu1 %v2662_v53  ;;  %v839_v53 = vld [vmem:[%s2763_s3] sm:$0x3]  ;;  %s2469_s3 = smov [#allocation9]  }
 0x5a6   :  { %s1877_s30 = sshll.u32 %s2469_s3, 4  ;;  %s1878_s30 = int_to_ptr.vmem [resolvable:$true] %s1877_s30 }
 0x5a7   :  { %1834 = vmatpush1.bf16.msra.mxu0 %v2301_v33  ;;  %s2429_s5 = scalar_lea.vmem %s1878_s30, 1024  ;;  %p2434_p11 = scmp.lt.s32.totalorder %s1878_s30, %s1878_s30 }
 0x5a8   :  { %1835 = vmatprep.subr.bf16.mxu0 %v2306_v34  ;;  %p2430_p10 = scmp.ne.s32.totalorder %s1878_s30, %s2429_s5  ;;  %p2435_p12 = scmp.lt.s32.totalorder %s2429_s5, %s2429_s5 }
 0x5aa   :  { %p2436_p13 = por %p2435_p12, %p2434_p11 }
 0x5ab   :  { %1836 = vmatpush1.bf16.msra.mxu0 %v2304_v35 }
 0x5ac   :  { %p2437_p0 = pnand %p2436_p13, %p2430_p10 }
 0x5ae   :  { %1854 = vmatmul.mubr.bf16.vlgmr.msra.gmra.mrb[32].mxu0 %v1473_v44 }
 0x659   :  { %v1073_v38 = vpop.f32.mrb[20].mxu1 }
 0x65a   :  { %v2092_v39 = vpop.f32.mrb[21].mxu1 }
 0x65b   :  { %v1076_v40 = vpop.f32.mrb[22].mxu1 }
 0x65c   :  { %v1080_v41 = vpack.c.bf16 %v1076_v40, %v1073_v38  ;;  %v2093_v42 = vpop.f32.mrb[23].mxu1 }
 0x65e   :  { %1210 = vmatmul.mubr.bf16.vlgmr.msra.gmra.mrb[24].mxu1 %v1080_v41 }
 0x65f   :  { %1301 = vmatpush1.bf16.msra.mxu1 %v2680_v22  ;;  %1332 = vmatprep.mubr.bf16.mxu1 %v2468_v13 }
 0x660   :  { %1302 = vmatprep.subr.bf16.mxu1 %v2683_v49 }
 0x661   :  { %v1594_v62 = vpop.f32.mrb[28].mxu0 }
 0x662   :  { %v2116_v12 = vpop.f32.mrb[29].mxu0 }
 0x663   :  { %1303 = vmatpush1.bf16.msra.mxu1 %v2286_v2  ;;  %v1597_v44 = vpop.f32.mrb[30].mxu0 }
 0x664   :  { %v1601_v43 = vpack.c.bf16 %v1597_v44, %v1594_v62  ;;  %v2117_v45 = vpop.f32.mrb[31].mxu0  ;;  %1304 = vmatprep.subr.bf16.mxu1 %v2291_v5 }
 0x667   :  { %1305 = vmatpush1.bf16.msra.mxu1 %v2289_v14 }
 0x668   :  { %1306 = vmatprep.subr.bf16.mxu1 %v2294_v17 }
 0x66b   :  { %1307 = vmatpush1.bf16.msra.mxu1 %v2292_v23 }
 0x66c   :  { %1308 = vmatprep.subr.bf16.mxu1 %v2297_v24 }
 0x66f   :  { %1309 = vmatpush1.bf16.msra.mxu1 %v2295_v28 }
 0x670   :  { %1310 = vmatprep.subr.bf16.mxu1 %v2300_v29 }
 0x673   :  { %1311 = vmatpush1.bf16.msra.mxu1 %v2298_v31 }
 0x674   :  { %1312 = vmatprep.subr.bf16.mxu1 %v2303_v32 }
 0x677   :  { %1313 = vmatpush1.bf16.msra.mxu1 %v2301_v33 }
 0x678   :  { %1314 = vmatprep.subr.bf16.mxu1 %v2306_v34 }
 0x67b   :  { %1315 = vmatpush1.bf16.msra.mxu1 %v2304_v35 }
 0x67c   :  { %1698 = vmatprep.subr.bf16.mxu1 %v2665_v55  ;;  %v1350_v55 = vsub.s32 1, %v1345_v51 }
 0x67e   :  { %1333 = vmatmul.mubr.bf16.vlgmr.msra.gmra.mrb[24].mxu1 %v952_v54  ;;  %v1346_v54 = vsub.s32 0, %v1345_v51  ;;  %v1351_v57 = vrot.slane %v839_v53, %v1350_v55 }
 0x67f   :  { %1699 = vmatpush1.bf16.msra.mxu1 %v2668_v4  ;;  %1730 = vmatprep.mubr.bf16.mxu1 %v2468_v13 }
 0x680   :  { %1700 = vmatprep.subr.bf16.mxu1 %v2670_v8  ;;  %v1347_v56 = vrot.slane %v839_v53, %v1346_v54 }
 0x681   :  { %v1855_v47 = vpop.f32.mrb[32].mxu0 }
 0x682   :  { %v1857_v48 = vpop.f32.mrb[33].mxu0 }
 0x683   :  { %1701 = vmatpush1.bf16.msra.mxu1 %v2674_v11  ;;  %v1859_v50 = vpop.f32.mrb[34].mxu0 }
 0x684   :  { %v1861_v52 = vpop.f32.mrb[35].mxu0  ;;  %1702 = vmatprep.subr.bf16.mxu1 %v2678_v15 }
 0x687   :  { %1703 = vmatpush1.bf16.msra.mxu1 %v2685_v58 }
 0x688   :  { %1704 = vmatprep.subr.bf16.mxu1 %v2688_v61 }
 0x68b   :  { %1705 = vmatpush1.bf16.msra.mxu1 %v2695_v6 }
 0x68c   :  { %1706 = vmatprep.subr.bf16.mxu1 %v2698_v10 }
 0x68f   :  { %1707 = vmatpush1.bf16.msra.mxu1 %v2701_v18 }
 0x690   :  { %1708 = vmatprep.subr.bf16.mxu1 %v2704_v20 }
 0x693   :  { %1709 = vmatpush1.bf16.msra.mxu1 %v2707_v26 }
 0x694   :  { %1710 = vmatprep.subr.bf16.mxu1 %v2710_v27 }
 0x697   :  { %1711 = vmatpush1.bf16.msra.mxu1 %v2713_v30 }
 0x698   :  { %1712 = vmatprep.subr.bf16.mxu1 %v2330_v36 }
 0x69b   :  { %1713 = vmatpush1.bf16.msra.mxu1 %v2328_v37 }
 0x69e   :  { %1731 = vmatmul.mubr.bf16.vlgmr.msra.gmra.mrb[28].mxu1 %v1601_v43 }
 0x751   :  { %v1334_v59 = vpop.f32.mrb[24].mxu1 }
 0x752   :  { %v1354_v60 = vadd.f32 %v1347_v56, %v1334_v59  ;;  %v1336_v63 = vpop.f32.mrb[25].mxu1 }
 0x753   :  { %v1355_v0 = vadd.f32 %v1351_v57, %v1336_v63  ;;  %v1338_v1 = vpop.f32.mrb[26].mxu1 }
 0x754   :  { %1358 = vst [vmem:[#allocation9] sm:$0xff] %v1354_v60  ;;  %v1356_v3 = vadd.f32 %v1347_v56, %v1338_v1  ;;  %v1340_v4 = vpop.f32.mrb[27].mxu1 }
 0x755   :  { %1359 = vst [vmem:[#allocation9 + $0x8] sm:$0xff] %v1355_v0  ;;  %v1357_v7 = vadd.f32 %v1351_v57, %v1340_v4 }
 0x756   :  { %1360 = vst [vmem:[#allocation9 + $0x10] sm:$0xff] %v1356_v3 }
 0x757   :  { %1361 = vst [vmem:[#allocation9 + $0x18] sm:$0xff] %v1357_v7 }
 0x771   :  { %v1732_v8 = vpop.f32.mrb[28].mxu1 }
 0x772   :  { %v1856_v9 = vadd.f32 %v1855_v47, %v1732_v8  ;;  %v1734_v11 = vpop.f32.mrb[29].mxu1 }
 0x773   :  { %v1858_v13 = vadd.f32 %v1857_v48, %v1734_v11  ;;  %v1736_v15 = vpop.f32.mrb[30].mxu1 }
 0x774   :  { %v1864_v16 = vadd.f32 %v1856_v9, %v1347_v56  ;;  %v1860_v19 = vadd.f32 %v1859_v50, %v1736_v15  ;;  %v1738_v21 = vpop.f32.mrb[31].mxu1 }
 0x775   :  { %v1865_v22 = vadd.f32 %v1858_v13, %v1351_v57  ;;  %v1862_v25 = vadd.f32 %v1861_v52, %v1738_v21 }
 0x776   :  { %1868 = vst [vmem:[#allocation9 + $0x20] sm:$0xff] %v1864_v16  ;;  %v1866_v49 = vadd.f32 %v1860_v19, %v1347_v56 }
 0x777   :  { %1869 = vst [vmem:[#allocation9 + $0x28] sm:$0xff] %v1865_v22  ;;  %v1867_v58 = vadd.f32 %v1862_v25, %v1351_v57 }
 0x778   :  { %1870 = vst [vmem:[#allocation9 + $0x30] sm:$0xff] %v1866_v49 }
 0x779   :  { %1871 = vst [vmem:[#allocation9 + $0x38] sm:$0xff] %v1867_v58 }
 0x77a   :  { %2440 = shalt.err (!%p2437_p0)
}
 0x77b   :  { %s2441_s8 = scalar_lea.hbm %s2764_s4, 1024 }
 0x77c   :  { %p2442_p1 = scmp.ne.s32.totalorder %s2764_s4, %s2441_s8  ;;  %p2445_p2 = scmp.lt.u32.totalorder %s2441_s8, %s2764_s4 }
 0x77e   :  { %p2447_p3 = pnand %p2445_p2, %p2442_p1 }
 0x780   :  { %2450 = shalt.err (!%p2447_p3)
}
 0x781   :  { %1883 = dma.vmem_to_hbm [thread:$0]  %s1878_s30, 1024, %s2764_s4, [#allocation5], %s2461_s1, %s2461_s1, %s2462_s13  }
 0x782   :  { %2455 = dma.done.wait [#allocation5], 1024  }
 0x783   :  { %2456 = vsyncadd [#allocation5], 4294966272 }
 0x784   :  { %1887 = vsyncpa [#allocation4], 1 }
 0x785   :  { %1888 = vsyncpa [#allocation7], 1 }
 0x786   :  { %1889 = vsyncpa [#allocation5], 1 }

</bundles_post_ra>
